<compile_context>
chip_gen: v5e
topology: v5e:2x2
jax: 0.10.0
libtpu: 0.0.40
codegen_flags: <defaults>
</compile_context>

<pallas_src>
import functools

import jax
import jax.numpy as jnp
from jax.experimental import pallas as pl
from jax.experimental.pallas import tpu as pltpu

_LANE = 1024   # lane-dense last dim (multiple of 128)
_TM = 256      # block rows (multiple of 8): (256, 1024) f32 block = 1 MiB / buffer


def _dropout_kernel(x_ref, bits_ref, o_ref, *, threshold, scale):
    # keep iff random int32 bits >= threshold  (P(keep) = 1 - p)
    keep = bits_ref[...] >= jnp.int32(threshold)
    x = x_ref[...]
    scaled = x * jnp.asarray(scale, dtype=x.dtype)
    o_ref[...] = jnp.where(keep, scaled, jnp.zeros((), dtype=scaled.dtype))


def _round_up(a, b):
    return ((a + b - 1) // b) * b


def gaudi_dropout(x, *, p, key, training):
    """Pallas implementation of GaudiDropout.forward."""
    if not training or p == 0.0:
        # nn.Dropout in eval mode (or p == 0) is the identity.
        return x
    if p >= 1.0:
        return jnp.zeros_like(x)

    orig_shape = x.shape
    total = x.size
    dtype = x.dtype

    # Lane-dense slab layout, padded so the block tiles it exactly.
    m_raw = pl.cdiv(total, _LANE)
    if m_raw <= _TM:
        tm = max(8, _round_up(m_raw, 8))
        m = tm
    else:
        tm = _TM
        m = _round_up(m_raw, _TM)
    padded = m * _LANE

    xf = x.reshape(-1)
    if padded != total:
        xf = jnp.pad(xf, (0, padded - total))
    x2d = xf.reshape(m, _LANE)

    # Uniform 32-bit random bits, reinterpreted as int32 for the threshold test.
    bits_u32 = jax.random.bits(key, (m, _LANE), dtype=jnp.uint32)
    bits_i32 = jax.lax.bitcast_convert_type(bits_u32, jnp.int32)

    # keep iff bits >= threshold, with P(keep) = 1 - p (signed mapping of p*2^32).
    threshold = int(round(p * (2.0 ** 32))) - 2 ** 31
    threshold = max(-(2 ** 31), min(threshold, 2 ** 31 - 1))
    scale = 1.0 / (1.0 - p)

    grid = (m // tm,)
    kernel = functools.partial(_dropout_kernel, threshold=threshold, scale=scale)

    itemsize = jnp.dtype(dtype).itemsize
    out2d = pl.pallas_call(
        kernel,
        out_shape=jax.ShapeDtypeStruct((m, _LANE), dtype),
        grid=grid,
        in_specs=[
            pl.BlockSpec((tm, _LANE), lambda i: (i, 0)),  # x
            pl.BlockSpec((tm, _LANE), lambda i: (i, 0)),  # random bits
        ],
        out_specs=pl.BlockSpec((tm, _LANE), lambda i: (i, 0)),
        compiler_params=pltpu.CompilerParams(
            dimension_semantics=("parallel",),  # independent tiles -> both v7x TCs
        ),
        cost_estimate=pl.CostEstimate(
            flops=padded,
            transcendentals=0,
            bytes_accessed=2 * padded * itemsize + padded * 4,
        ),
    )(x2d, bits_i32)

    return out2d.reshape(-1)[:total].reshape(orig_shape)


if __name__ == "__main__":
    key = jax.random.PRNGKey(0)
    kx, kmask = jax.random.split(key)

    # Small NCHW activation tensor, consistent with wrapping an arbitrary dropout input.
    x = jax.random.normal(kx, (2, 4, 16, 16), dtype=jnp.float32)
    p = 0.1

    # Training-mode dropout (the interesting path).
    out_train = gaudi_dropout(x, p=p, key=kmask, training=True)
    out_train = jax.block_until_ready(out_train)

    # Eval-mode path (identity), mirroring self.dropout.training == False.
    out_eval = gaudi_dropout(x, p=p, key=kmask, training=False)
    out_eval = jax.block_until_ready(out_eval)

    # Sanity checks on dropout semantics.
    assert out_train.shape == x.shape and out_train.dtype == x.dtype
    assert bool(jnp.all(out_eval == x))
    mask = out_train != 0
    # surviving elements are exactly x / (1 - p)
    assert bool(
        jnp.allclose(
            jnp.where(mask, out_train, 0.0),
            jnp.where(mask, x / (1.0 - p), 0.0),
            rtol=1e-5, atol=1e-5,
        )
    )
    # some (but not all) elements dropped at p=0.1 on 2048 elements
    dropped = int(jnp.sum(~mask))
    assert 0 < dropped < x.size

    print("KERNEL_OK")
</pallas_src>

<mosaic_0001>
module attributes {stable_mosaic.version = 11 : i64} {
  func.func @_dropout_kernel(%arg0: i32, %arg1: memref<8x1024xf32, #tpu.memory_space<vmem>>, %arg2: memref<8x1024xi32, #tpu.memory_space<vmem>>, %arg3: memref<8x1024xf32, #tpu.memory_space<vmem>>) attributes {dimension_semantics = [#tpu.dimension_semantics<parallel>], iteration_bounds = array<i64: 1>, scalar_prefetch = 0 : i64, scratch_operands = 0 : i64, tpu.core_type = #tpu.core_type<tc>, window_params = [{transform_indices = @transform_0, window_bounds = array<i64: 8, 1024>}, {transform_indices = @transform_1, window_bounds = array<i64: 8, 1024>}, {transform_indices = @transform_2, window_bounds = array<i64: 8, 1024>}]} {
    %c0 = arith.constant 0 : index
    %c0_0 = arith.constant 0 : index
    %0 = vector.load %arg2[%c0, %c0_0] : memref<8x1024xi32, #tpu.memory_space<vmem>>, vector<8x1024xi32>
    %c-1717986918_i32 = arith.constant -1717986918 : i32
    %1 = vector.broadcast %c-1717986918_i32 : i32 to vector<8x1024xi32>
    %2 = arith.cmpi sge, %0, %1 : vector<8x1024xi32>
    %c0_1 = arith.constant 0 : index
    %c0_2 = arith.constant 0 : index
    %3 = vector.load %arg1[%c0_1, %c0_2] : memref<8x1024xf32, #tpu.memory_space<vmem>>, vector<8x1024xf32>
    %cst = arith.constant 1.11111116 : f32
    %4 = vector.broadcast %cst : f32 to vector<8x1024xf32>
    %5 = arith.mulf %3, %4 : vector<8x1024xf32>
    %cst_3 = arith.constant 0.000000e+00 : f32
    %6 = vector.broadcast %cst_3 : f32 to vector<8x1024xf32>
    %7 = arith.select %2, %5, %6 : vector<8x1024xi1>, vector<8x1024xf32>
    %c0_4 = arith.constant 0 : index
    %c0_5 = arith.constant 0 : index
    %8 = vector.load %arg3[%c0_4, %c0_5] : memref<8x1024xf32, #tpu.memory_space<vmem>>, vector<8x1024xf32>
    tpu.vector_store %arg3[%c0_4, %c0_5], %7 {strides = array<i32>} : memref<8x1024xf32, #tpu.memory_space<vmem>>, vector<8x1024xf32>,
    return
  }
  func.func @transform_0(%arg0: i32) -> (i32, i32) {
    %c0_i32 = arith.constant 0 : i32
    %c0_i32_0 = arith.constant 0 : i32
    return %arg0, %c0_i32 : i32, i32
  }
  func.func @transform_1(%arg0: i32) -> (i32, i32) {
    %c0_i32 = arith.constant 0 : i32
    %c0_i32_0 = arith.constant 0 : i32
    return %arg0, %c0_i32 : i32, i32
  }
  func.func @transform_2(%arg0: i32) -> (i32, i32) {
    %c0_i32 = arith.constant 0 : i32
    %c0_i32_0 = arith.constant 0 : i32
    return %arg0, %c0_i32 : i32, i32
  }
}

</mosaic_0001>

<bundles_post_ra>
// kernel: tpu_custom_call.1
= control target key start
LH: loop header
LB: loop body
LE: loop exit
PB: predicated region body
PF: predicated region fallthrough
CT: control target
= control target key end

     0   :  { %7 = vsyncpa [#allocation3], 0  ;;  %s214_s0 = inlined_call_operand.hbm [shape: f32[8,1024], index: 0, kind: input, shape index: {}]   ;;  %s215_s1 = inlined_call_operand.hbm [shape: s32[8,1024], index: 1, kind: input, shape index: {}]   ;;  %s216_s2 = inlined_call_operand.hbm [shape: f32[8,1024], index: 2, kind: output, shape index: {}]  }
   0x1   :  { %8 = vsyncpa [#allocation6], 0 }
   0x2   :  { %9 = vsyncpa [#allocation4], 0  ;;  %s15_s11 = sshll.u32 %s214_s0, 4  ;;  %s187_s12 = smov [#allocation2]   ;;  %s16_s11 = int_to_ptr.hbm [resolvable:$true] %s15_s11 }
   0x3   :  { %s17_s13 = sshll.u32 %s187_s12, 4  ;;  %s26_s16 = sshll.u32 %s215_s1, 4  ;;  %s18_s13 = int_to_ptr.vmem [resolvable:$true] %s17_s13  ;;  %s27_s16 = int_to_ptr.hbm [resolvable:$true] %s26_s16 }
   0x4   :  { %20 = dma.hbm_to_vmem [thread:$0]  %s16_s11, 1024, %s18_s13, [#allocation3]  }
   0x5   :  { %s188_s17 = smov [#allocation5]  }
   0x6   :  { %s28_s18 = sshll.u32 %s188_s17, 4  ;;  %s29_s18 = int_to_ptr.vmem [resolvable:$true] %s28_s18 }
   0x7   :  { %31 = dma.hbm_to_vmem [thread:$0]  %s27_s16, 1024, %s29_s18, [#allocation6]  }
   0x8   :  { %181 = dma.done.wait [#allocation3], 1024  }
   0x9   :  { %182 = vsyncadd [#allocation3], 4294966272 }
   0xa   :  { %183 = dma.done.wait [#allocation6], 1024  }
   0xb   :  { %184 = vsyncadd [#allocation6], 4294966272  ;;  %v40_v0 = vld [vmem:[#allocation5] sm:$0xff]  ;;  %v41_v2 = vld [vmem:[#allocation5 + $0x8] sm:$0xff]  ;;  %s189_s0 = smov [#allocation7]   ;;  %s95_s21 = sshll.u32 %s216_s2, 4  ;;  %s96_s21 = int_to_ptr.hbm [resolvable:$true] %s95_s21 }
   0xc   :  { %v56_v1 = vld [vmem:[#allocation2] sm:$0xff]  ;;  %vm48_vm0 = vcmp.ge.s32.totalorder %v40_v0, 2576980378  ;;  %vm49_vm1 = vcmp.ge.s32.totalorder %v41_v2, 2576980378  ;;  %v57_v4 = vld [vmem:[#allocation2 + $0x8] sm:$0xff] }
   0xd   :  { %v64_v3 = vmul.f32 1.1111112, %v56_v1  ;;  %v42_v5 = vld [vmem:[#allocation5 + $0x10] sm:$0xff]  ;;  %v65_v8 = vmul.f32 1.1111112, %v57_v4  ;;  %v43_v9 = vld [vmem:[#allocation5 + $0x18] sm:$0xff] }
   0xe   :  { %v58_v6 = vld [vmem:[#allocation2 + $0x10] sm:$0xff]  ;;  %vm50_vm2 = vcmp.ge.s32.totalorder %v42_v5, 2576980378  ;;  %vm51_vm3 = vcmp.ge.s32.totalorder %v43_v9, 2576980378  ;;  %v59_v11 = vld [vmem:[#allocation2 + $0x18] sm:$0xff] }
   0xf   :  { %v72_v7 = vsel %vm48_vm0, %v64_v3, 0.0  ;;  %v66_v10 = vmul.f32 1.1111112, %v58_v6  ;;  %v73_v12 = vsel %vm49_vm1, %v65_v8, 0.0  ;;  %v67_v13 = vmul.f32 1.1111112, %v59_v11 }
  0x10   :  { %80 = vst [vmem:[#allocation7] sm:$0xff] %v72_v7  ;;  %v44_v14 = vld [vmem:[#allocation5 + $0x20] sm:$0xff]  ;;  %v45_v16 = vld [vmem:[#allocation5 + $0x28] sm:$0xff]  ;;  %v46_v21 = vld [vmem:[#allocation5 + $0x30] sm:$0xff]  ;;  %s93_s1 = sshll.u32 %s189_s0, 4  ;;  %s94_s1 = int_to_ptr.vmem [resolvable:$true] %s93_s1 }
  0x11   :  { %v60_v15 = vld [vmem:[#allocation2 + $0x20] sm:$0xff]  ;;  %81 = vst [vmem:[#allocation7 + $0x8] sm:$0xff] %v73_v12  ;;  %v74_v17 = vsel %vm50_vm2, %v66_v10, 0.0  ;;  %vm52_vm4 = vcmp.ge.s32.totalorder %v44_v14, 2576980378  ;;  %v75_v19 = vsel %vm51_vm3, %v67_v13, 0.0 }
  0x12   :  { %v68_v18 = vmul.f32 1.1111112, %v60_v15  ;;  %82 = vst [vmem:[#allocation7 + $0x10] sm:$0xff] %v74_v17  ;;  %vm53_vm5 = vcmp.ge.s32.totalorder %v45_v16, 2576980378  ;;  %v61_v20 = vld [vmem:[#allocation2 + $0x28] sm:$0xff] }
  0x13   :  { %83 = vst [vmem:[#allocation7 + $0x18] sm:$0xff] %v75_v19  ;;  %v69_v23 = vmul.f32 1.1111112, %v61_v20  ;;  %vm54_vm6 = vcmp.ge.s32.totalorder %v46_v21, 2576980378  ;;  %v62_v24 = vld [vmem:[#allocation2 + $0x30] sm:$0xff] }
  0x14   :  { %v76_v22 = vsel %vm52_vm4, %v68_v18, 0.0  ;;  %v47_v25 = vld [vmem:[#allocation5 + $0x38] sm:$0xff]  ;;  %v70_v28 = vmul.f32 1.1111112, %v62_v24 }
  0x15   :  { %84 = vst [vmem:[#allocation7 + $0x20] sm:$0xff] %v76_v22  ;;  %v63_v26 = vld [vmem:[#allocation2 + $0x38] sm:$0xff]  ;;  %v77_v27 = vsel %vm53_vm5, %v69_v23, 0.0  ;;  %vm55_vm7 = vcmp.ge.s32.totalorder %v47_v25, 2576980378 }
  0x16   :  { %85 = vst [vmem:[#allocation7 + $0x28] sm:$0xff] %v77_v27  ;;  %v71_v29 = vmul.f32 1.1111112, %v63_v26  ;;  %v78_v30 = vsel %vm54_vm6, %v70_v28, 0.0 }
  0x17   :  { %86 = vst [vmem:[#allocation7 + $0x30] sm:$0xff] %v78_v30 }
  0x18   :  { %v79_v31 = vsel %vm55_vm7, %v71_v29, 0.0 }
  0x19   :  { %87 = vst [vmem:[#allocation7 + $0x38] sm:$0xff] %v79_v31 }
  0x1a   :  { %98 = dma.vmem_to_hbm [thread:$0]  %s94_s1, 1024, %s96_s21, [#allocation4]  }
  0x1b   :  { %185 = dma.done.wait [#allocation4], 1024  }
  0x1c   :  { %186 = vsyncadd [#allocation4], 4294966272 }
  0x1d   :  { %103 = vsyncpa [#allocation3], 1 }
  0x1e   :  { %104 = vsyncpa [#allocation6], 1 }
  0x1f   :  { %105 = vsyncpa [#allocation4], 1 }

</bundles_post_ra>
